<compile_context>
chip_gen: v6e
topology: v6e:2x2x1
jax: 0.10.0
libtpu: 0.0.40
codegen_flags: <defaults>
</compile_context>

<pallas_src>
import jax
import jax.numpy as jnp
from jax import lax
from jax.experimental import pallas as pl
from jax.experimental.pallas import tpu as pltpu


N_REAL = 5          # 3 "cate" + 2 "confi" output columns
N_PAD = 8           # padded head width (real outputs live in columns 0..4)
TK_MAX = 2048       # max K-reduction tile (multiple of 128)
TB_MAX = 256        # max batch tile (multiple of 8)
NEG_BIG = -1.0e30   # finite "minus infinity" for masked softmax lanes


def _round_up(x, m):
    return ((x + m - 1) // m) * m


def _make_kernel(tk):
    """Grid (B_pad//TB, D_pad//tk).  x:(TB,tk) bf16, w:(D_pad,N_PAD) bf16
    (VMEM-resident), b:(1,N_PAD) f32, o:(TB,N_PAD) f32, acc:(TB,N_PAD) f32."""

    def kernel(x_ref, w_ref, b_ref, o_ref, acc_ref):
        k = pl.program_id(1)
        nk = pl.num_programs(1)

        @pl.when(k == 0)
        def _():
            # Bias folded into the accumulator init (drops the epilogue add).
            acc_ref[...] = jnp.broadcast_to(b_ref[...], acc_ref.shape)

        # Slice the VMEM-resident fused weight for this K step.
        off = pl.multiple_of(k * tk, 128)
        w_tile = w_ref[pl.ds(off, tk), :]                     # (tk, N_PAD) bf16
        acc_ref[...] += jnp.dot(x_ref[...], w_tile,
                                preferred_element_type=jnp.float32)

        @pl.when(k == nk - 1)
        def _():
            logits = acc_ref[...]                             # (TB, N_PAD) f32
            tb, f = logits.shape
            col = lax.broadcasted_iota(jnp.int32, (tb, f), 1)
            cate_mask = col < 3                                      # cols 0..2
            confi_mask = jnp.logical_and(col >= 3, col < N_REAL)     # cols 3..4

            # softmax over the "cate" group (exact division -> sums to 1)
            c_l = jnp.where(cate_mask, logits, NEG_BIG)
            c_e = jnp.where(cate_mask,
                            jnp.exp(c_l - jnp.max(c_l, axis=1, keepdims=True)),
                            0.0)
            c_soft = c_e / jnp.sum(c_e, axis=1, keepdims=True)

            # softmax over the "confi" group
            f_l = jnp.where(confi_mask, logits, NEG_BIG)
            f_e = jnp.where(confi_mask,
                            jnp.exp(f_l - jnp.max(f_l, axis=1, keepdims=True)),
                            0.0)
            f_soft = f_e / jnp.sum(f_e, axis=1, keepdims=True)

            # Groups are disjoint and already zeroed outside their masks.
            o_ref[...] = c_soft + f_soft

    return kernel


def fuse_and_pad_params(w_bb, b_bb, w1, b1):
    """Fold backbone Linear + head Linear into one (D_pad, N_PAD) bf16 weight
    and a (1, N_PAD) f32 bias.  Done once; weights are static across calls."""
    d = w_bb.shape[0]
    w_fused = jnp.dot(w_bb, w1, precision=lax.Precision.HIGHEST)      # (D, 5)
    b_fused = jnp.dot(b_bb, w1, precision=lax.Precision.HIGHEST) + b1  # (5,)
    d128 = _round_up(d, 128)
    tk = d128 if d128 <= TK_MAX else TK_MAX
    d_pad = _round_up(d, tk)
    wp = jnp.zeros((d_pad, N_PAD), jnp.float32).at[:d, :N_REAL].set(w_fused)
    bp = jnp.zeros((1, N_PAD), jnp.float32).at[0, :N_REAL].set(b_fused)
    return wp.astype(jnp.bfloat16), bp


@jax.jit
def mango_juror_forward(x, wp, bp):
    """x: (B, C, H, W) f32.  wp: (D_pad, N_PAD) bf16, bp: (1, N_PAD) f32.
    Returns (B, 5) f32."""
    B = x.shape[0]
    d = 1
    for s in x.shape[1:]:
        d *= s
    d_pad = wp.shape[0]
    tk = d_pad if d_pad <= TK_MAX else TK_MAX
    assert d_pad % tk == 0
    tb = min(TB_MAX, _round_up(B, 8))
    b_pad = _round_up(B, tb)
    nb, nk = b_pad // tb, d_pad // tk

    # Zero-pad + bf16 cast fused under the same jit as the kernel.
    xf = x.reshape(B, d).astype(jnp.bfloat16)
    xp = jnp.zeros((b_pad, d_pad), jnp.bfloat16).at[:B, :d].set(xf)

    out_padded = pl.pallas_call(
        _make_kernel(tk),
        out_shape=jax.ShapeDtypeStruct((b_pad, N_PAD), jnp.float32),
        grid_spec=pltpu.PrefetchScalarGridSpec(
            num_scalar_prefetch=0,
            grid=(nb, nk),
            in_specs=[
                pl.BlockSpec((tb, tk), lambda b, k: (b, k)),         # activations
                pl.BlockSpec((d_pad, N_PAD), lambda b, k: (0, 0)),   # resident fused weight
                pl.BlockSpec((1, N_PAD), lambda b, k: (0, 0)),       # fused bias
            ],
            out_specs=pl.BlockSpec((tb, N_PAD), lambda b, k: (b, 0)),
            scratch_shapes=[pltpu.VMEM((tb, N_PAD), jnp.float32)],
        ),
        compiler_params=pltpu.CompilerParams(
            dimension_semantics=("parallel", "arbitrary"),   # batch parallel, K reduction
            vmem_limit_bytes=32 * 1024 * 1024,               # safe on v5e/v6e/v7x
        ),
    )(xp, wp, bp)
    return out_padded[:B, :N_REAL]


def init_params(key, in_features, hidden=1000, out_features=N_REAL):
    """PyTorch nn.Linear-style uniform(-1/sqrt(fan_in), 1/sqrt(fan_in)) init."""
    k1, k2, k3, k4 = jax.random.split(key, 4)
    bnd_bb = 1.0 / jnp.sqrt(in_features)
    bnd_l1 = 1.0 / jnp.sqrt(hidden)
    w_bb = jax.random.uniform(k1, (in_features, hidden), jnp.float32, -bnd_bb, bnd_bb)
    b_bb = jax.random.uniform(k2, (hidden,), jnp.float32, -bnd_bb, bnd_bb)
    w1 = jax.random.uniform(k3, (hidden, out_features), jnp.float32, -bnd_l1, bnd_l1)
    b1 = jax.random.uniform(k4, (out_features,), jnp.float32, -bnd_l1, bnd_l1)
    return w_bb, b_bb, w1, b1


def reference_forward_f32(x, w_bb, b_bb, w1, b1):
    """Original two-layer f32 path (module semantics)."""
    B = x.shape[0]
    feats = jnp.dot(x.reshape(B, -1), w_bb, precision=lax.Precision.HIGHEST) + b_bb
    logits = jnp.dot(feats, w1, precision=lax.Precision.HIGHEST) + b1
    cate = jax.nn.softmax(logits[:, 0:3], axis=1)
    confi = jax.nn.softmax(logits[:, 3:], axis=1)
    return jnp.concatenate([cate, confi], axis=1)


def reference_forward_matched(x, wp, bp):
    """Same fused bf16 weights / bf16 activations as the kernel."""
    B = x.shape[0]
    d_pad = wp.shape[0]
    xf = x.reshape(B, -1).astype(jnp.bfloat16).astype(jnp.float32)
    xp = jnp.zeros((B, d_pad), jnp.float32).at[:, :xf.shape[1]].set(xf)
    logits = jnp.dot(xp, wp.astype(jnp.float32),
                     precision=lax.Precision.HIGHEST) + bp
    cate = jax.nn.softmax(logits[:, 0:3], axis=1)
    confi = jax.nn.softmax(logits[:, 3:N_REAL], axis=1)
    return jnp.concatenate([cate, confi], axis=1)


if __name__ == "__main__":
    key = jax.random.PRNGKey(0)
    kx, kp = jax.random.split(key)

    B, C, H, W = 2, 4, 16, 16                # small NCHW input, D = 1024
    x = jax.random.normal(kx, (B, C, H, W), jnp.float32)

    w_bb, b_bb, w1, b1 = init_params(kp, C * H * W)
    wp, bp = fuse_and_pad_params(w_bb, b_bb, w1, b1)   # one-time fusion + padding

    out = mango_juror_forward(x, wp, bp)
    out = jax.block_until_ready(out)

    assert out.shape == (B, N_REAL)
    # Each softmax group must sum to ~1 (exact division in the epilogue).
    assert jnp.allclose(out[:, :3].sum(axis=1), 1.0, atol=1e-3)
    assert jnp.allclose(out[:, 3:].sum(axis=1), 1.0, atol=1e-3)
    # Tight check vs. a reference using the identical fused bf16 weights.
    ref_m = reference_forward_matched(x, wp, bp)
    assert jnp.allclose(out, ref_m, atol=5e-3, rtol=5e-3)
    # Loose check vs. the original un-fused f32 module semantics.
    ref_f32 = reference_forward_f32(x, w_bb, b_bb, w1, b1)
    assert jnp.allclose(out, ref_f32, atol=3e-2, rtol=3e-2)

    print("KERNEL_OK")
</pallas_src>

<mosaic_0001>
module attributes {stable_mosaic.version = 11 : i64} {
  func.func @kernel(%arg0: i32, %arg1: i32, %arg2: memref<8x1024xbf16, #tpu.memory_space<vmem>>, %arg3: memref<1024x8xbf16, #tpu.memory_space<vmem>>, %arg4: memref<1x8xf32, #tpu.memory_space<vmem>>, %arg5: memref<8x8xf32, #tpu.memory_space<vmem>>, %arg6: memref<8x8xf32, #tpu.memory_space<vmem>>) attributes {dimension_semantics = [#tpu.dimension_semantics<parallel>, #tpu.dimension_semantics<arbitrary>], iteration_bounds = array<i64: 1, 1>, scalar_prefetch = 0 : i64, scratch_operands = 1 : i64, tpu.core_type = #tpu.core_type<tc>, window_params = [{transform_indices = @transform_0, window_bounds = array<i64: 8, 1024>}, {pipeline_mode = #tpu.pipeline_mode<synchronous>, transform_indices = @transform_1, window_bounds = array<i64: 1024, 8>}, {pipeline_mode = #tpu.pipeline_mode<synchronous>, transform_indices = @transform_2, window_bounds = array<i64: 1, 8>}, {transform_indices = @transform_3, window_bounds = array<i64: 8, 8>}]} {
    %c0_i32 = arith.constant 0 : i32
    %0 = arith.cmpi eq, %arg1, %c0_i32 : i32
    %1 = arith.extui %0 : i1 to i32
    %c0_i32_0 = arith.constant 0 : i32
    %2 = arith.cmpi ne, %1, %c0_i32_0 : i32
    scf.if %2 {
      %c0_9 = arith.constant 0 : index
      %c0_10 = arith.constant 0 : index
      %15 = vector.load %arg4[%c0_9, %c0_10] : memref<1x8xf32, #tpu.memory_space<vmem>>, vector<1x8xf32>
      %16 = vector.shape_cast %15 : vector<1x8xf32> to vector<1x8xf32>
      %17 = vector.broadcast %16 : vector<1x8xf32> to vector<8x8xf32>
      %c0_11 = arith.constant 0 : index
      %c0_12 = arith.constant 0 : index
      %18 = vector.load %arg6[%c0_11, %c0_12] : memref<8x8xf32, #tpu.memory_space<vmem>>, vector<8x8xf32>
      tpu.vector_store %arg6[%c0_11, %c0_12], %17 {strides = array<i32>} : memref<8x8xf32, #tpu.memory_space<vmem>>, vector<8x8xf32>,
    } else {
    }
    %c1024_i32 = arith.constant 1024 : i32
    %3 = arith.muli %arg1, %c1024_i32 : i32
    %4 = tpu.assume_multiple %3, 128 : i32
    %5 = arith.index_cast %4 : i32 to index
    %c0 = arith.constant 0 : index
    %6 = vector.load %arg3[%5, %c0] : memref<1024x8xbf16, #tpu.memory_space<vmem>>, vector<1024x8xbf16>
    %c0_1 = arith.constant 0 : index
    %c0_2 = arith.constant 0 : index
    %7 = vector.load %arg6[%c0_1, %c0_2] : memref<8x8xf32, #tpu.memory_space<vmem>>, vector<8x8xf32>
    %c0_3 = arith.constant 0 : index
    %c0_4 = arith.constant 0 : index
    %8 = vector.load %arg2[%c0_3, %c0_4] : memref<8x1024xbf16, #tpu.memory_space<vmem>>, vector<8x1024xbf16>
    %cst = arith.constant dense<0.000000e+00> : vector<8x8xf32>
    %9 = tpu.matmul %8, %6, %cst {dimension_numbers = #tpu.dot_dimension_numbers<[1], [0], [0], [1], [0, 0, 1, 1], [], []>} : vector<8x1024xbf16>, vector<1024x8xbf16>, vector<8x8xf32> -> vector<8x8xf32>
    %10 = arith.addf %7, %9 : vector<8x8xf32>
    %c0_5 = arith.constant 0 : index
    %c0_6 = arith.constant 0 : index
    %11 = vector.load %arg6[%c0_5, %c0_6] : memref<8x8xf32, #tpu.memory_space<vmem>>, vector<8x8xf32>
    tpu.vector_store %arg6[%c0_5, %c0_6], %10 {strides = array<i32>} : memref<8x8xf32, #tpu.memory_space<vmem>>, vector<8x8xf32>,
    %c0_i32_7 = arith.constant 0 : i32
    %12 = arith.cmpi eq, %arg1, %c0_i32_7 : i32
    %13 = arith.extui %12 : i1 to i32
    %c0_i32_8 = arith.constant 0 : i32
    %14 = arith.cmpi ne, %13, %c0_i32_8 : i32
    scf.if %14 {
      %c0_9 = arith.constant 0 : index
      %c0_10 = arith.constant 0 : index
      %15 = vector.load %arg6[%c0_9, %c0_10] : memref<8x8xf32, #tpu.memory_space<vmem>>, vector<8x8xf32>
      %16 = tpu.iota {dimensions = array<i32: 1>} : vector<8x8xi32>
      %c3_i32 = arith.constant 3 : i32
      %17 = vector.broadcast %c3_i32 : i32 to vector<8x8xi32>
      %18 = arith.cmpi slt, %16, %17 : vector<8x8xi32>
      %c3_i32_11 = arith.constant 3 : i32
      %19 = vector.broadcast %c3_i32_11 : i32 to vector<8x8xi32>
      %20 = arith.cmpi sge, %16, %19 : vector<8x8xi32>
      %c5_i32 = arith.constant 5 : i32
      %21 = vector.broadcast %c5_i32 : i32 to vector<8x8xi32>
      %22 = arith.cmpi slt, %16, %21 : vector<8x8xi32>
      %23 = arith.andi %20, %22 : vector<8x8xi1>
      %cst_12 = arith.constant -1.000000e+30 : f32
      %24 = vector.broadcast %cst_12 : f32 to vector<8x8xf32>
      %25 = arith.select %18, %15, %24 : vector<8x8xi1>, vector<8x8xf32>
      %cst_13 = arith.constant dense<0xFF800000> : vector<8xf32>
      %26 = vector.multi_reduction <maximumf>, %25, %cst_13 [1] : vector<8x8xf32> to vector<8xf32>
      %27 = vector.shape_cast %26 : vector<8xf32> to vector<8x1xf32>
      %28 = vector.broadcast %27 : vector<8x1xf32> to vector<8x8xf32>
      %29 = arith.subf %25, %28 : vector<8x8xf32>
      %30 = math.exp %29 : vector<8x8xf32>
      %cst_14 = arith.constant 0.000000e+00 : f32
      %31 = vector.broadcast %cst_14 : f32 to vector<8x8xf32>
      %32 = arith.select %18, %30, %31 : vector<8x8xi1>, vector<8x8xf32>
      %cst_15 = arith.constant dense<0.000000e+00> : vector<8xf32>
      %33 = vector.multi_reduction <add>, %32, %cst_15 [1] : vector<8x8xf32> to vector<8xf32>
      %34 = vector.shape_cast %33 : vector<8xf32> to vector<8x1xf32>
      %35 = vector.broadcast %34 : vector<8x1xf32> to vector<8x8xf32>
      %36 = arith.divf %32, %35 : vector<8x8xf32>
      %cst_16 = arith.constant -1.000000e+30 : f32
      %37 = vector.broadcast %cst_16 : f32 to vector<8x8xf32>
      %38 = arith.select %23, %15, %37 : vector<8x8xi1>, vector<8x8xf32>
      %cst_17 = arith.constant dense<0xFF800000> : vector<8xf32>
      %39 = vector.multi_reduction <maximumf>, %38, %cst_17 [1] : vector<8x8xf32> to vector<8xf32>
      %40 = vector.shape_cast %39 : vector<8xf32> to vector<8x1xf32>
      %41 = vector.broadcast %40 : vector<8x1xf32> to vector<8x8xf32>
      %42 = arith.subf %38, %41 : vector<8x8xf32>
      %43 = math.exp %42 : vector<8x8xf32>
      %cst_18 = arith.constant 0.000000e+00 : f32
      %44 = vector.broadcast %cst_18 : f32 to vector<8x8xf32>
      %45 = arith.select %23, %43, %44 : vector<8x8xi1>, vector<8x8xf32>
      %cst_19 = arith.constant dense<0.000000e+00> : vector<8xf32>
      %46 = vector.multi_reduction <add>, %45, %cst_19 [1] : vector<8x8xf32> to vector<8xf32>
      %47 = vector.shape_cast %46 : vector<8xf32> to vector<8x1xf32>
      %48 = vector.broadcast %47 : vector<8x1xf32> to vector<8x8xf32>
      %49 = arith.divf %45, %48 : vector<8x8xf32>
      %50 = arith.addf %36, %49 : vector<8x8xf32>
      %c0_20 = arith.constant 0 : index
      %c0_21 = arith.constant 0 : index
      %51 = vector.load %arg5[%c0_20, %c0_21] : memref<8x8xf32, #tpu.memory_space<vmem>>, vector<8x8xf32>
      tpu.vector_store %arg5[%c0_20, %c0_21], %50 {strides = array<i32>} : memref<8x8xf32, #tpu.memory_space<vmem>>, vector<8x8xf32>,
    } else {
    }
    return
  }
  func.func @transform_0(%arg0: i32, %arg1: i32) -> (i32, i32) {
    %c0_i32 = arith.constant 0 : i32
    return %arg0, %arg1 : i32, i32
  }
  func.func @transform_1(%arg0: i32, %arg1: i32) -> (i32, i32) {
    %c0_i32 = arith.constant 0 : i32
    %c0_i32_0 = arith.constant 0 : i32
    %c0_i32_1 = arith.constant 0 : i32
    return %c0_i32, %c0_i32_0 : i32, i32
  }
  func.func @transform_2(%arg0: i32, %arg1: i32) -> (i32, i32) {
    %c0_i32 = arith.constant 0 : i32
    %c0_i32_0 = arith.constant 0 : i32
    %c0_i32_1 = arith.constant 0 : i32
    return %c0_i32, %c0_i32_0 : i32, i32
  }
  func.func @transform_3(%arg0: i32, %arg1: i32) -> (i32, i32) {
    %c0_i32 = arith.constant 0 : i32
    %c0_i32_0 = arith.constant 0 : i32
    return %arg0, %c0_i32 : i32, i32
  }
}

</mosaic_0001>

<bundles_post_ra>
// kernel: mango_juror_forward.1
= control target key start
LH: loop header
LB: loop body
LE: loop exit
PB: predicated region body
PF: predicated region fallthrough
CT: control target
= control target key end

     0   :  { %vm26_vm0 = vcmask 64512   ;;  %s1273_s1 = inlined_call_operand.vmem [shape: bf16[1024,8], index: 1, kind: input, shape index: {}]   ;;  %s1274_s0 = inlined_call_operand.vmem [shape: bf16[8,1024], index: 0, kind: input, shape index: {}]   ;;  %s1275_s2 = inlined_call_operand.vmem [shape: f32[1,8], index: 2, kind: input, shape index: {}]   ;;  %s1276_s3 = inlined_call_operand.vmem [shape: f32[8,8], index: 3, kind: output, shape index: {}]  }
   0x1   :  { %v946_v0 = vld [vmem:[%s1273_s1 + $0x78] sm:$0xff]   ;;  %v950_v4 = vld [vmem:[%s1273_s1 + $0x70] sm:$0xff]   ;;  %v954_v8 = vld [vmem:[%s1273_s1 + $0x68] sm:$0xff]  }
   0x2   :  { %v947_v1 = vld [vmem:[%s1273_s1 + $0xf8] sm:$0xff]   ;;  %858 = vmatprep.subr.bf16.mxu0 %v946_v0  ;;  %v951_v5 = vld [vmem:[%s1273_s1 + $0xf0] sm:$0xff]   ;;  %v955_v9 = vld [vmem:[%s1273_s1 + $0xe8] sm:$0xff]  }
   0x3   :  { %v948_v2 = vld [vmem:[%s1273_s1 + $0x38] sm:$0xff]   ;;  %880 = vmatprep.subr.bf16.mxu1 %v947_v1  ;;  %v952_v6 = vld [vmem:[%s1273_s1 + $0x30] sm:$0xff]   ;;  %v956_v10 = vld [vmem:[%s1273_s1 + $0x28] sm:$0xff]  }
   0x4   :  { %v949_v3 = vld [vmem:[%s1273_s1 + $0xb8] sm:$0xff]   ;;  %859 = vmatpush3.bf16.msra.mxu0 %v948_v2  ;;  %v953_v7 = vld [vmem:[%s1273_s1 + $0xb0] sm:$0xff]   ;;  %v957_v11 = vld [vmem:[%s1273_s1 + $0xa8] sm:$0xff]  }
   0x5   :  { %881 = vmatpush3.bf16.msra.mxu1 %v949_v3  ;;  %860 = vmatprep.subr.bf16.mxu0 %v950_v4  ;;  %v958_v12 = vld [vmem:[%s1273_s1 + $0x60] sm:$0xff]   ;;  %v962_v16 = vld [vmem:[%s1273_s1 + $0x58] sm:$0xff]   ;;  %v966_v20 = vld [vmem:[%s1273_s1 + $0x50] sm:$0xff]  }
   0x6   :  { %882 = vmatprep.subr.bf16.mxu1 %v951_v5  ;;  %v959_v13 = vld [vmem:[%s1273_s1 + $0xe0] sm:$0xff]   ;;  %v963_v17 = vld [vmem:[%s1273_s1 + $0xd8] sm:$0xff]   ;;  %v967_v21 = vld [vmem:[%s1273_s1 + $0xd0] sm:$0xff]  }
   0x7   :  { %v960_v14 = vld [vmem:[%s1273_s1 + $0x20] sm:$0xff]   ;;  %v964_v18 = vld [vmem:[%s1273_s1 + $0x18] sm:$0xff]   ;;  %v968_v22 = vld [vmem:[%s1273_s1 + $0x10] sm:$0xff]  }
   0x8   :  { %861 = vmatpush3.bf16.msra.mxu0 %v952_v6  ;;  %v961_v15 = vld [vmem:[%s1273_s1 + $0xa0] sm:$0xff]   ;;  %v965_v19 = vld [vmem:[%s1273_s1 + $0x98] sm:$0xff]   ;;  %v969_v23 = vld [vmem:[%s1273_s1 + $0x90] sm:$0xff]  }
   0x9   :  { %883 = vmatpush3.bf16.msra.mxu1 %v953_v7  ;;  %862 = vmatprep.subr.bf16.mxu0 %v954_v8  ;;  %v970_v24 = vld [vmem:[%s1273_s1 + $0x48] sm:$0xff]   ;;  %v974_v28 = vld [vmem:[%s1273_s1 + $0x40] sm:$0xff]   ;;  %v982_v38 = vld [vmem:[%s1273_s1 + $0x178] sm:$0xff]  }
   0xa   :  { %884 = vmatprep.subr.bf16.mxu1 %v955_v9  ;;  %v971_v25 = vld [vmem:[%s1273_s1 + $0xc8] sm:$0xff]   ;;  %v975_v29 = vld [vmem:[%s1273_s1 + $0xc0] sm:$0xff]   ;;  %v983_v39 = vld [vmem:[%s1273_s1 + $0x1f8] sm:$0xff]  }
   0xb   :  { %v972_v26 = vld [vmem:[%s1273_s1 + $0x8] sm:$0xff]   ;;  %v976_v30 = vld [vmem:[%s1273_s1] sm:$0xff]   ;;  %v984_v40 = vld [vmem:[%s1273_s1 + $0x138] sm:$0xff]  }
   0xc   :  { %863 = vmatpush3.bf16.msra.mxu0 %v956_v10  ;;  %v973_v27 = vld [vmem:[%s1273_s1 + $0x88] sm:$0xff]   ;;  %v977_v31 = vld [vmem:[%s1273_s1 + $0x80] sm:$0xff]   ;;  %v985_v41 = vld [vmem:[%s1273_s1 + $0x1b8] sm:$0xff]  }
   0xd   :  { %885 = vmatpush3.bf16.msra.mxu1 %v957_v11  ;;  %864 = vmatprep.subr.bf16.mxu0 %v958_v12  ;;  %v162_v32 = vld [vmem:[%s1274_s0] sm:$0xff]  ;;  %v163_v33 = vld [vmem:[%s1274_s0 + $0x8] sm:$0xff]  ;;  %v986_v42 = vld [vmem:[%s1273_s1 + $0x170] sm:$0xff]  }
   0xe   :  { %886 = vmatprep.subr.bf16.mxu1 %v959_v13  ;;  %v786_v34 = vcombine.low %v162_v32, %v162_v32  ;;  %v787_v35 = vcombine.high %v162_v32, %v162_v32  ;;  %v788_v36 = vcombine.low %v163_v33, %v163_v33  ;;  %v789_v37 = vcombine.high %v163_v33, %v163_v33  ;;  %v987_v43 = vld [vmem:[%s1273_s1 + $0x1f0] sm:$0xff]   ;;  %v990_v46 = vld [vmem:[%s1273_s1 + $0x168] sm:$0xff]   ;;  %v994_v50 = vld [vmem:[%s1273_s1 + $0x160] sm:$0xff]  }
   0xf   :  { %v988_v44 = vld [vmem:[%s1273_s1 + $0x130] sm:$0xff]   ;;  %v991_v47 = vld [vmem:[%s1273_s1 + $0x1e8] sm:$0xff]   ;;  %v995_v51 = vld [vmem:[%s1273_s1 + $0x1e0] sm:$0xff]  }
  0x10   :  { %865 = vmatpush3.bf16.msra.mxu0 %v960_v14  ;;  %610 = vmatprep.mubr.bf16.mxu0 %v787_v35  ;;  %v989_v45 = vld [vmem:[%s1273_s1 + $0x1b0] sm:$0xff]   ;;  %v992_v48 = vld [vmem:[%s1273_s1 + $0x128] sm:$0xff]   ;;  %v996_v52 = vld [vmem:[%s1273_s1 + $0x120] sm:$0xff]  }
  0x11   :  { %887 = vmatpush3.bf16.msra.mxu1 %v961_v15  ;;  %866 = vmatprep.subr.bf16.mxu0 %v962_v16  ;;  %v993_v49 = vld [vmem:[%s1273_s1 + $0x1a8] sm:$0xff]   ;;  %v997_v53 = vld [vmem:[%s1273_s1 + $0x1a0] sm:$0xff]   ;;  %v998_v54 = vld [vmem:[%s1273_s1 + $0x158] sm:$0xff]  }
  0x12   :  { %888 = vmatprep.subr.bf16.mxu1 %v963_v17  ;;  %650 = vmatprep.mubr.bf16.mxu1 %v789_v37  ;;  %v999_v55 = vld [vmem:[%s1273_s1 + $0x1d8] sm:$0xff]   ;;  %v1002_v58 = vld [vmem:[%s1273_s1 + $0x150] sm:$0xff]   ;;  %v1006_v62 = vld [vmem:[%s1273_s1 + $0x148] sm:$0xff]   ;;  %v745_v37 = vlaneseq }
  0x13   :  { %v1000_v56 = vld [vmem:[%s1273_s1 + $0x118] sm:$0xff]   ;;  %v1003_v59 = vld [vmem:[%s1273_s1 + $0x1d0] sm:$0xff]   ;;  %v1007_v63 = vld [vmem:[%s1273_s1 + $0x1c8] sm:$0xff]  }
  0x14   :  { %867 = vmatpush3.bf16.msra.mxu0 %v964_v18  ;;  %v1001_v57 = vld [vmem:[%s1273_s1 + $0x198] sm:$0xff]   ;;  %v1004_v60 = vld [vmem:[%s1273_s1 + $0x110] sm:$0xff]   ;;  %v1008_v0 = vld [vmem:[%s1273_s1 + $0x108] sm:$0xff]  }
  0x15   :  { %889 = vmatpush3.bf16.msra.mxu1 %v965_v19  ;;  %868 = vmatprep.subr.bf16.mxu0 %v966_v20  ;;  %v1005_v61 = vld [vmem:[%s1273_s1 + $0x190] sm:$0xff]   ;;  %v1009_v1 = vld [vmem:[%s1273_s1 + $0x188] sm:$0xff]   ;;  %v1010_v2 = vld [vmem:[%s1273_s1 + $0x140] sm:$0xff]  }
  0x16   :  { %890 = vmatprep.subr.bf16.mxu1 %v967_v21  ;;  %v1011_v3 = vld [vmem:[%s1273_s1 + $0x1c0] sm:$0xff]   ;;  %v164_v6 = vld [vmem:[%s1274_s0 + $0x10] sm:$0xff]  ;;  %v165_v9 = vld [vmem:[%s1274_s0 + $0x18] sm:$0xff] }
  0x17   :  { %v1012_v4 = vld [vmem:[%s1273_s1 + $0x100] sm:$0xff]   ;;  %v790_v7 = vcombine.low %v164_v6, %v164_v6  ;;  %v791_v8 = vcombine.high %v164_v6, %v164_v6  ;;  %v792_v10 = vcombine.low %v165_v9, %v165_v9  ;;  %v793_v11 = vcombine.high %v165_v9, %v165_v9 }
  0x18   :  { %869 = vmatpush3.bf16.msra.mxu0 %v968_v22  ;;  %v1013_v5 = vld [vmem:[%s1273_s1 + $0x180] sm:$0xff]  }
  0x19   :  { %891 = vmatpush3.bf16.msra.mxu1 %v969_v23  ;;  %870 = vmatprep.subr.bf16.mxu0 %v970_v24  ;;  %v785_v12 = vld [vmem:[%s1275_s2] ss:$0 sm:$0xff] }
  0x1a   :  { %892 = vmatprep.subr.bf16.mxu1 %v971_v25  ;;  %27 = vst.msk [vmem:[#allocation2] sm:$0xff] %vm26_vm0, %v785_v12 }
  0x1c   :  { %871 = vmatpush3.bf16.msra.mxu0 %v972_v26 }
  0x1d   :  { %893 = vmatpush3.bf16.msra.mxu1 %v973_v27  ;;  %872 = vmatprep.subr.bf16.mxu0 %v974_v28 }
  0x1e   :  { %894 = vmatprep.subr.bf16.mxu1 %v975_v29 }
  0x20   :  { %873 = vmatpush3.bf16.msra.mxu0 %v976_v30 }
  0x21   :  { %895 = vmatpush3.bf16.msra.mxu1 %v977_v31  ;;  %902 = vmatprep.subr.bf16.mxu0 %v982_v38  ;;  %v161_v33 = vld [vmem:[#allocation2] sm:$0xff] }
  0x22   :  { %924 = vmatprep.subr.bf16.mxu1 %v983_v39  ;;  %v746_v39 = vand.u32 127, %v745_v37 }
  0x23   :  { %611 = vmatmul.mubr.bf16.vlgmr.msra.gmra.mxu0 %v786_v34 }
  0x24   :  { %651 = vmatmul.mubr.bf16.vlgmr.msra.gmra.mxu1 %v788_v36  ;;  %903 = vmatpush3.bf16.msra.mxu0 %v984_v40  ;;  %vm748_vm1 = vcmp.ge.s32.totalorder %v746_v39, 3  ;;  %vm749_vm2 = vcmp.lt.s32.totalorder %v746_v39, 5  ;;  %vm747_vm3 = vcmp.lt.s32.totalorder %v746_v39, 3 }
  0x25   :  { %925 = vmatpush3.bf16.msra.mxu1 %v985_v41  ;;  %904 = vmatprep.subr.bf16.mxu0 %v986_v42  ;;  %vm1255_vm4 = vmand %vm748_vm1, %vm749_vm2 }
  0x26   :  { %926 = vmatprep.subr.bf16.mxu1 %v987_v43  ;;  %690 = vmatprep.mubr.bf16.mxu0 %v791_v8 }
  0x27   :  { %730 = vmatprep.mubr.bf16.mxu1 %v793_v11 }
  0x28   :  { %905 = vmatpush3.bf16.msra.mxu0 %v988_v44 }
  0x29   :  { %927 = vmatpush3.bf16.msra.mxu1 %v989_v45  ;;  %906 = vmatprep.subr.bf16.mxu0 %v990_v46 }
  0x2a   :  { %928 = vmatprep.subr.bf16.mxu1 %v991_v47 }
  0x2c   :  { %907 = vmatpush3.bf16.msra.mxu0 %v992_v48 }
  0x2d   :  { %929 = vmatpush3.bf16.msra.mxu1 %v993_v49  ;;  %908 = vmatprep.subr.bf16.mxu0 %v994_v50 }
  0x2e   :  { %930 = vmatprep.subr.bf16.mxu1 %v995_v51 }
  0x30   :  { %909 = vmatpush3.bf16.msra.mxu0 %v996_v52 }
  0x31   :  { %931 = vmatpush3.bf16.msra.mxu1 %v997_v53  ;;  %910 = vmatprep.subr.bf16.mxu0 %v998_v54 }
  0x32   :  { %932 = vmatprep.subr.bf16.mxu1 %v999_v55 }
  0x34   :  { %911 = vmatpush3.bf16.msra.mxu0 %v1000_v56 }
  0x35   :  { %933 = vmatpush3.bf16.msra.mxu1 %v1001_v57  ;;  %912 = vmatprep.subr.bf16.mxu0 %v1002_v58 }
  0x36   :  { %934 = vmatprep.subr.bf16.mxu1 %v1003_v59 }
  0x38   :  { %913 = vmatpush3.bf16.msra.mxu0 %v1004_v60 }
  0x39   :  { %935 = vmatpush3.bf16.msra.mxu1 %v1005_v61  ;;  %914 = vmatprep.subr.bf16.mxu0 %v1006_v62 }
  0x3a   :  { %936 = vmatprep.subr.bf16.mxu1 %v1007_v63 }
  0x3c   :  { %915 = vmatpush3.bf16.msra.mxu0 %v1008_v0 }
  0x3d   :  { %937 = vmatpush3.bf16.msra.mxu1 %v1009_v1  ;;  %916 = vmatprep.subr.bf16.mxu0 %v1010_v2 }
  0x3e   :  { %938 = vmatprep.subr.bf16.mxu1 %v1011_v3 }
  0x40   :  { %917 = vmatpush3.bf16.msra.mxu0 %v1012_v4 }
  0x41   :  { %939 = vmatpush3.bf16.msra.mxu1 %v1013_v5 }
  0x43   :  { %691 = vmatmul.mubr.bf16.vlgmr.msra.gmra.mxu0 %v790_v7 }
  0x44   :  { %731 = vmatmul.mubr.bf16.vlgmr.msra.gmra.mxu1 %v792_v10 }
  0xe3   :  { %v874_v13 = vpop.f32.mrf.mxu0 }
  0xe4   :  { %v896_v14 = vpop.f32.mrf.mxu1 }
  0xe5   :  { %v875_v15 = vpop.f32.mrf.mxu0 }
  0xe6   :  { %v897_v16 = vpop.f32.mrf.mxu1  ;;  %v876_v21 = vadd.f32 %v875_v15, %v874_v13 }
  0xe7   :  { %v877_v17 = vpop.f32.mrf.mxu0  ;;  %v898_v22 = vadd.f32 %v897_v16, %v896_v14 }
  0xe8   :  { %v899_v18 = vpop.f32.mrf.mxu1 }
  0xe9   :  { %v878_v19 = vpop.f32.mrf.mxu0  ;;  %v653_v27 = vadd.f32 %v898_v22, %v876_v21 }
  0xea   :  { %v900_v20 = vpop.f32.mrf.mxu1 }
 0x103   :  { %v918_v23 = vpop.f32.mrf.mxu0 }
 0x104   :  { %v940_v24 = vpop.f32.mrf.mxu1 }
 0x105   :  { %v919_v25 = vpop.f32.mrf.mxu0 }
 0x106   :  { %v941_v26 = vpop.f32.mrf.mxu1  ;;  %v920_v28 = vadd.f32 %v919_v25, %v918_v23 }
 0x107   :  { %v921_v29 = vpop.f32.mrf.mxu0  ;;  %v942_v32 = vadd.f32 %v941_v26, %v940_v24 }
 0x108   :  { %v943_v30 = vpop.f32.mrf.mxu1  ;;  %v693_v31 = vadd.f32 %v920_v28, %v653_v27 }
 0x109   :  { %v922_v34 = vpop.f32.mrf.mxu0 }
 0x10a   :  { %v944_v35 = vpop.f32.mrf.mxu1  ;;  %v733_v36 = vadd.f32 %v942_v32, %v693_v31 }
 0x10c   :  { %v738_v38 = vadd.f32 %v733_v36, %v161_v33 }
 0x10e   :  { %740 = vst.msk [vmem:[#allocation2] sm:$0xff] %vm26_vm0, %v738_v38 }
 0x115   :  { %v744_v40 = vld [vmem:[#allocation2] sm:$0xff] }
 0x116   :  { %v751_v42 = vsel %vm747_vm3, %v744_v40, -1e+30  ;;  %v764_v44 = vsel %vm1255_vm4, %v744_v40, -1e+30 }
 0x117   :  { %v752_v43 = vsel %vm26_vm0, %v751_v42, -inf  ;;  %v765_v45 = vsel %vm26_vm0, %v764_v44, -inf }
 0x118   :  { %753 = vmax.xlane.f32.xlu0 %v752_v43 }
 0x11c   :  { %766 = vmax.xlane.f32.xlu0 %v765_v45 }
 0x1a1   :  { %v754_v46 = vpop.xlane.xlu0 %753 }
 0x1a2   :  { %v755_v47 = vsub.f32 %v751_v42, %v754_v46 }
 0x1a4   :  { %v756_v48 = vmul.f32 1.442695, %v755_v47 }
 0x1a5   :  { %v767_v49 = vpop.xlane.xlu0 %766 }
 0x1a6   :  { %1018 = vpow2.f32 %v756_v48  ;;  %v768_v50 = vsub.f32 %v764_v44, %v767_v49 }
 0x1a8   :  { %v769_v51 = vmul.f32 1.442695, %v768_v50 }
 0x1aa   :  { %1020 = vpow2.f32 %v769_v51 }
 0x1b3   :  { %v1019_v52 = vpop.eup %1018 }
 0x1b4   :  { %v758_v53 = vsel %vm747_vm3, %v1019_v52, 0.0 }
 0x1b5   :  { %v759_v54 = vsel %vm26_vm0, %v758_v53, 0.0 }
 0x1b6   :  { %760 = vadd.xlane.f32.xlu1 %v759_v54 }
 0x1b7   :  { %v1021_v55 = vpop.eup %1020 }
 0x1b8   :  { %v771_v56 = vsel %vm1255_vm4, %v1021_v55, 0.0 }
 0x1b9   :  { %v772_v57 = vsel %vm26_vm0, %v771_v56, 0.0 }
 0x1ba   :  { %773 = vadd.xlane.f32.xlu1 %v772_v57 }
 0x23f   :  { %v761_v58 = vpop.xlane.xlu1 %760 }
 0x240   :  { %1022 = vrcp.f32 %v761_v58 }
 0x243   :  { %v774_v59 = vpop.xlane.xlu1 %773 }
 0x244   :  { %1024 = vrcp.f32 %v774_v59 }
 0x24d   :  { %v1023_v60 = vpop.eup %1022 }
 0x24e   :  { %v763_v62 = vmul.f32 %v1023_v60, %v758_v53 }
 0x251   :  { %v1025_v61 = vpop.eup %1024 }
 0x252   :  { %v776_v63 = vmul.f32 %v1025_v61, %v771_v56 }
 0x254   :  { %v777_v0 = vadd.f32 %v776_v63, %v763_v62 }
 0x256   :  { %778 = vst.msk [vmem:[%s1276_s3] sm:$0xff] %vm26_vm0, %v777_v0 }

</bundles_post_ra>
